<compile_context>
chip_gen: v7x
topology: tpu7x:2x2x1
jax: 0.10.0
libtpu: 0.0.40
codegen_flags: <defaults>
</compile_context>

<pallas_src>
import functools

import jax
import jax.numpy as jnp
from jax.experimental import pallas as pl
from jax.experimental.pallas import tpu as pltpu


def _gelu(x, approximate):
    if approximate:
        # tanh approximation: EUP path, cheaper on VALU-bound shapes.
        c = 0.7978845608028654  # sqrt(2/pi)
        return 0.5 * x * (1.0 + jnp.tanh(c * (x + 0.044715 * x * x * x)))
    # torch F.gelu default: exact erf formulation.
    return 0.5 * x * (1.0 + jax.lax.erf(x * 0.7071067811865476))


def _softplus(x):
    # numerically stable softplus: max(x,0) + log1p(exp(-|x|))
    return jnp.maximum(x, 0.0) + jnp.log1p(jnp.exp(-jnp.abs(x)))


def _round_up(n, m):
    return ((n + m - 1) // m) * m


def _kernel(h_ref,
            w1_ref, b1_ref,
            w2_ref, b2_ref,
            wh_ref, bh_ref,
            mu_ref, var_ref,
            act_ref,
            *, approximate_gelu):
    d_lat = mu_ref.shape[-1]

    # f32 HBM tile -> bf16 MXU operand (in-kernel cast; no extra HBM pass).
    h = h_ref[...].astype(jnp.bfloat16)

    # enc1 -> GELU  (f32 accumulate, activation staged in bf16 VMEM scratch)
    o = jnp.dot(h, w1_ref[...], preferred_element_type=jnp.float32) + b1_ref[...]
    act_ref[...] = _gelu(o, approximate_gelu).astype(jnp.bfloat16)

    # enc2 -> GELU
    o = jnp.dot(act_ref[...], w2_ref[...], preferred_element_type=jnp.float32) + b2_ref[...]
    act_ref[...] = _gelu(o, approximate_gelu).astype(jnp.bfloat16)

    # fused {mu | var} head: one (D_in, 2*D_lat) matmul, split along lanes.
    head = jnp.dot(act_ref[...], wh_ref[...], preferred_element_type=jnp.float32) + bh_ref[...]
    mu_ref[...] = head[:, :d_lat].astype(mu_ref.dtype)
    var_ref[...] = _softplus(head[:, d_lat:]).astype(var_ref.dtype)


def prepare_params(raw):
    """One-time weight prep: bf16 cast + fused {mu|var} head. Call once, reuse."""
    return dict(
        w1=raw["w1"].astype(jnp.bfloat16),
        b1=raw["b1"].astype(jnp.float32),
        w2=raw["w2"].astype(jnp.bfloat16),
        b2=raw["b2"].astype(jnp.float32),
        wh=jnp.concatenate([raw["wmu"], raw["wvar"]], axis=1).astype(jnp.bfloat16),
        bh=jnp.concatenate([raw["bmu"], raw["bvar"]], axis=1).astype(jnp.float32),
    )


def variational_encoder(h, prepared, *, tb=256, vmem_limit_bytes=None,
                        approximate_gelu=False):
    """h: (B, input_dim) float32. prepared: output of prepare_params()."""
    B, D_in = h.shape
    D_lat = prepared["wh"].shape[1] // 2
    assert D_in % 128 == 0 and D_lat % 128 == 0, "feature dims must be 128-lane aligned"

    # Batch tile: multiple of 8, <= padded batch, and capped so the grid has >= 2
    # steps whenever the batch allows it (v7x megacore needs >= 2 parallel steps).
    Bp = _round_up(B, 8)
    tb = max(8, min(_round_up(tb, 8), Bp))
    if Bp >= 16:
        tb = min(tb, _round_up(pl.cdiv(Bp, 2), 8))
    grid = (pl.cdiv(B, tb),)

    if vmem_limit_bytes is None:
        try:
            vmem_limit_bytes = int(0.75 * pltpu.get_tpu_info().vmem_capacity_bytes)
        except Exception:  # pragma: no cover - conservative fallback
            vmem_limit_bytes = 48 * 1024 * 1024

    def resident(shape):
        # Constant index_map across the grid -> never re-fetched; single VMEM buffer.
        return pl.BlockSpec(shape, lambda i: (0, 0), pipeline_mode=pl.Buffered(1))

    out_shapes = (
        jax.ShapeDtypeStruct((B, D_lat), jnp.float32),  # mu
        jax.ShapeDtypeStruct((B, D_lat), jnp.float32),  # var
    )

    weight_bytes = (2 * D_in * D_in + 2 * D_in * D_lat) * 2 + (2 * D_in + 2 * D_lat) * 4
    cost = pl.CostEstimate(
        flops=2 * B * (2 * D_in * D_in + 2 * D_in * D_lat),
        transcendentals=B * (2 * D_in + D_lat),
        bytes_accessed=weight_bytes + B * D_in * 4 + 2 * B * D_lat * 4,
    )

    kernel = functools.partial(_kernel, approximate_gelu=approximate_gelu)

    mu, var = pl.pallas_call(
        kernel,
        out_shape=out_shapes,
        grid_spec=pltpu.PrefetchScalarGridSpec(
            num_scalar_prefetch=0,
            grid=grid,
            in_specs=[
                pl.BlockSpec((tb, D_in), lambda i: (i, 0)),              # h tile (f32)
                resident((D_in, D_in)),      resident((1, D_in)),        # enc1
                resident((D_in, D_in)),      resident((1, D_in)),        # enc2
                resident((D_in, 2 * D_lat)), resident((1, 2 * D_lat)),   # fused mu|var head
            ],
            out_specs=[
                pl.BlockSpec((tb, D_lat), lambda i: (i, 0)),
                pl.BlockSpec((tb, D_lat), lambda i: (i, 0)),
            ],
            scratch_shapes=[pltpu.VMEM((tb, D_in), jnp.bfloat16)],        # staged activation
        ),
        compiler_params=pltpu.CompilerParams(
            dimension_semantics=("parallel",),
            vmem_limit_bytes=vmem_limit_bytes),
        cost_estimate=cost,
    )(h.astype(jnp.float32),
      prepared["w1"], prepared["b1"],
      prepared["w2"], prepared["b2"],
      prepared["wh"], prepared["bh"])

    return mu, var


def init_params(key, input_dim, latent_dim):
    """Deterministic init mimicking torch.nn.Linear defaults (uniform +-1/sqrt(fan_in)).
    Weights are stored transposed: (in_dim, out_dim)."""
    ks = jax.random.split(key, 8)

    def lin(kw, kb, fan_in, fan_out):
        bound = 1.0 / jnp.sqrt(fan_in)
        w_t = jax.random.uniform(kw, (fan_in, fan_out), jnp.float32, -bound, bound)
        b = jax.random.uniform(kb, (1, fan_out), jnp.float32, -bound, bound)
        return w_t, b

    w1, b1 = lin(ks[0], ks[1], input_dim, input_dim)
    w2, b2 = lin(ks[2], ks[3], input_dim, input_dim)
    wmu, bmu = lin(ks[4], ks[5], input_dim, latent_dim)
    wvar, bvar = lin(ks[6], ks[7], input_dim, latent_dim)
    return dict(w1=w1, b1=b1, w2=w2, b2=b2,
                wmu=wmu, bmu=bmu, wvar=wvar, bvar=bvar)


def reference_forward(h, p):
    o = jax.nn.gelu(h @ p["w1"] + p["b1"], approximate=False)
    o = jax.nn.gelu(o @ p["w2"] + p["b2"], approximate=False)
    mu = o @ p["wmu"] + p["bmu"]
    var = jax.nn.softplus(o @ p["wvar"] + p["bvar"])
    return mu, var


if __name__ == "__main__":
    key = jax.random.PRNGKey(0)
    k_h, k_p = jax.random.split(key)

    batch, input_dim, latent_dim = 12, 128, 128  # non-multiple-of-8 batch -> ragged tile
    h = jax.random.normal(k_h, (batch, input_dim), jnp.float32)
    raw_params = init_params(k_p, input_dim, latent_dim)
    prepared = prepare_params(raw_params)   # one-time weight prep (bf16 + fused head)
    jax.block_until_ready(prepared)

    mu, var = variational_encoder(h, prepared)
    jax.block_until_ready((mu, var))

    mu_ref, var_ref = reference_forward(h, raw_params)
    assert mu.shape == (batch, latent_dim) and var.shape == (batch, latent_dim)
    # bf16 MXU operands (f32 accumulation) vs. f32 reference -> looser tolerance.
    assert jnp.allclose(mu, mu_ref, atol=5e-2, rtol=5e-2)
    assert jnp.allclose(var, var_ref, atol=5e-2, rtol=5e-2)
    assert bool(jnp.all(var >= 0.0))  # softplus output is non-negative

    # Multi-step grid: exercises the resident single-buffered weights across steps
    # and the >=2-step batch split for megacore.
    h2 = jax.random.normal(jax.random.PRNGKey(1), (24, input_dim), jnp.float32)
    mu2, var2 = variational_encoder(h2, prepared, tb=8)
    jax.block_until_ready((mu2, var2))
    mu2_ref, var2_ref = reference_forward(h2, raw_params)
    assert jnp.allclose(mu2, mu2_ref, atol=5e-2, rtol=5e-2)
    assert jnp.allclose(var2, var2_ref, atol=5e-2, rtol=5e-2)

    # tanh-GELU fast path still tracks the exact-erf reference at these scales.
    mu3, var3 = variational_encoder(h, prepared, approximate_gelu=True)
    jax.block_until_ready((mu3, var3))
    assert jnp.allclose(mu3, mu_ref, atol=7e-2, rtol=7e-2)
    assert jnp.allclose(var3, var_ref, atol=7e-2, rtol=7e-2)

    print("KERNEL_OK")
</pallas_src>

<mosaic_0001>
module attributes {stable_mosaic.version = 11 : i64} {
  func.func @_kernel(%arg0: i32, %arg1: memref<8x128xf32, #tpu.memory_space<vmem>>, %arg2: memref<128x128xbf16, #tpu.memory_space<vmem>>, %arg3: memref<1x128xf32, #tpu.memory_space<vmem>>, %arg4: memref<128x128xbf16, #tpu.memory_space<vmem>>, %arg5: memref<1x128xf32, #tpu.memory_space<vmem>>, %arg6: memref<128x256xbf16, #tpu.memory_space<vmem>>, %arg7: memref<1x256xf32, #tpu.memory_space<vmem>>, %arg8: memref<8x128xf32, #tpu.memory_space<vmem>>, %arg9: memref<8x128xf32, #tpu.memory_space<vmem>>, %arg10: memref<8x128xbf16, #tpu.memory_space<vmem>>) attributes {dimension_semantics = [#tpu.dimension_semantics<parallel>], iteration_bounds = array<i64: 2>, scalar_prefetch = 0 : i64, scratch_operands = 1 : i64, tpu.core_type = #tpu.core_type<tc>, window_params = [{transform_indices = @transform_0, window_bounds = array<i64: 8, 128>}, {pipeline_mode = #tpu.pipeline_mode<synchronous>, transform_indices = @transform_1, window_bounds = array<i64: 128, 128>}, {pipeline_mode = #tpu.pipeline_mode<synchronous>, transform_indices = @transform_2, window_bounds = array<i64: 1, 128>}, {pipeline_mode = #tpu.pipeline_mode<synchronous>, transform_indices = @transform_3, window_bounds = array<i64: 128, 128>}, {pipeline_mode = #tpu.pipeline_mode<synchronous>, transform_indices = @transform_4, window_bounds = array<i64: 1, 128>}, {pipeline_mode = #tpu.pipeline_mode<synchronous>, transform_indices = @transform_5, window_bounds = array<i64: 128, 256>}, {pipeline_mode = #tpu.pipeline_mode<synchronous>, transform_indices = @transform_6, window_bounds = array<i64: 1, 256>}, {transform_indices = @transform_7, window_bounds = array<i64: 8, 128>}, {transform_indices = @transform_8, window_bounds = array<i64: 8, 128>}]} {
    %c0 = arith.constant 0 : index
    %c0_0 = arith.constant 0 : index
    %0 = vector.load %arg1[%c0, %c0_0] : memref<8x128xf32, #tpu.memory_space<vmem>>, vector<8x128xf32>
    %1 = arith.truncf %0 : vector<8x128xf32> to vector<8x128xbf16>
    %c0_1 = arith.constant 0 : index
    %c0_2 = arith.constant 0 : index
    %2 = vector.load %arg2[%c0_1, %c0_2] : memref<128x128xbf16, #tpu.memory_space<vmem>>, vector<128x128xbf16>
    %cst = arith.constant dense<0.000000e+00> : vector<8x128xf32>
    %3 = tpu.matmul %1, %2, %cst {dimension_numbers = #tpu.dot_dimension_numbers<[1], [0], [0], [1], [0, 0, 1, 1], [], []>} : vector<8x128xbf16>, vector<128x128xbf16>, vector<8x128xf32> -> vector<8x128xf32>
    %c0_3 = arith.constant 0 : index
    %c0_4 = arith.constant 0 : index
    %4 = vector.load %arg3[%c0_3, %c0_4] : memref<1x128xf32, #tpu.memory_space<vmem>>, vector<1x128xf32>
    %5 = vector.broadcast %4 : vector<1x128xf32> to vector<8x128xf32>
    %6 = arith.addf %3, %5 : vector<8x128xf32>
    %cst_5 = arith.constant 5.000000e-01 : f32
    %7 = vector.broadcast %cst_5 : f32 to vector<8x128xf32>
    %8 = arith.mulf %7, %6 : vector<8x128xf32>
    %cst_6 = arith.constant 0.707106769 : f32
    %9 = vector.broadcast %cst_6 : f32 to vector<8x128xf32>
    %10 = arith.mulf %6, %9 : vector<8x128xf32>
    %11 = math.erf %10 : vector<8x128xf32>
    %cst_7 = arith.constant 1.000000e+00 : f32
    %12 = vector.broadcast %cst_7 : f32 to vector<8x128xf32>
    %13 = arith.addf %12, %11 : vector<8x128xf32>
    %14 = arith.mulf %8, %13 : vector<8x128xf32>
    %15 = arith.truncf %14 : vector<8x128xf32> to vector<8x128xbf16>
    %c0_8 = arith.constant 0 : index
    %c0_9 = arith.constant 0 : index
    %16 = vector.load %arg10[%c0_8, %c0_9] : memref<8x128xbf16, #tpu.memory_space<vmem>>, vector<8x128xbf16>
    tpu.vector_store %arg10[%c0_8, %c0_9], %15 {strides = array<i32>} : memref<8x128xbf16, #tpu.memory_space<vmem>>, vector<8x128xbf16>,
    %c0_10 = arith.constant 0 : index
    %c0_11 = arith.constant 0 : index
    %17 = vector.load %arg10[%c0_10, %c0_11] : memref<8x128xbf16, #tpu.memory_space<vmem>>, vector<8x128xbf16>
    %c0_12 = arith.constant 0 : index
    %c0_13 = arith.constant 0 : index
    %18 = vector.load %arg4[%c0_12, %c0_13] : memref<128x128xbf16, #tpu.memory_space<vmem>>, vector<128x128xbf16>
    %cst_14 = arith.constant dense<0.000000e+00> : vector<8x128xf32>
    %19 = tpu.matmul %17, %18, %cst_14 {dimension_numbers = #tpu.dot_dimension_numbers<[1], [0], [0], [1], [0, 0, 1, 1], [], []>} : vector<8x128xbf16>, vector<128x128xbf16>, vector<8x128xf32> -> vector<8x128xf32>
    %c0_15 = arith.constant 0 : index
    %c0_16 = arith.constant 0 : index
    %20 = vector.load %arg5[%c0_15, %c0_16] : memref<1x128xf32, #tpu.memory_space<vmem>>, vector<1x128xf32>
    %21 = vector.broadcast %20 : vector<1x128xf32> to vector<8x128xf32>
    %22 = arith.addf %19, %21 : vector<8x128xf32>
    %cst_17 = arith.constant 5.000000e-01 : f32
    %23 = vector.broadcast %cst_17 : f32 to vector<8x128xf32>
    %24 = arith.mulf %23, %22 : vector<8x128xf32>
    %cst_18 = arith.constant 0.707106769 : f32
    %25 = vector.broadcast %cst_18 : f32 to vector<8x128xf32>
    %26 = arith.mulf %22, %25 : vector<8x128xf32>
    %27 = math.erf %26 : vector<8x128xf32>
    %cst_19 = arith.constant 1.000000e+00 : f32
    %28 = vector.broadcast %cst_19 : f32 to vector<8x128xf32>
    %29 = arith.addf %28, %27 : vector<8x128xf32>
    %30 = arith.mulf %24, %29 : vector<8x128xf32>
    %31 = arith.truncf %30 : vector<8x128xf32> to vector<8x128xbf16>
    %c0_20 = arith.constant 0 : index
    %c0_21 = arith.constant 0 : index
    %32 = vector.load %arg10[%c0_20, %c0_21] : memref<8x128xbf16, #tpu.memory_space<vmem>>, vector<8x128xbf16>
    tpu.vector_store %arg10[%c0_20, %c0_21], %31 {strides = array<i32>} : memref<8x128xbf16, #tpu.memory_space<vmem>>, vector<8x128xbf16>,
    %c0_22 = arith.constant 0 : index
    %c0_23 = arith.constant 0 : index
    %33 = vector.load %arg10[%c0_22, %c0_23] : memref<8x128xbf16, #tpu.memory_space<vmem>>, vector<8x128xbf16>
    %c0_24 = arith.constant 0 : index
    %c0_25 = arith.constant 0 : index
    %34 = vector.load %arg6[%c0_24, %c0_25] : memref<128x256xbf16, #tpu.memory_space<vmem>>, vector<128x256xbf16>
    %cst_26 = arith.constant dense<0.000000e+00> : vector<8x256xf32>
    %35 = tpu.matmul %33, %34, %cst_26 {dimension_numbers = #tpu.dot_dimension_numbers<[1], [0], [0], [1], [0, 0, 1, 1], [], []>} : vector<8x128xbf16>, vector<128x256xbf16>, vector<8x256xf32> -> vector<8x256xf32>
    %c0_27 = arith.constant 0 : index
    %c0_28 = arith.constant 0 : index
    %36 = vector.load %arg7[%c0_27, %c0_28] : memref<1x256xf32, #tpu.memory_space<vmem>>, vector<1x256xf32>
    %37 = vector.broadcast %36 : vector<1x256xf32> to vector<8x256xf32>
    %38 = arith.addf %35, %37 : vector<8x256xf32>
    %39 = vector.extract_strided_slice %38 {offsets = [0, 0], sizes = [8, 128], strides = [1, 1]} : vector<8x256xf32> to vector<8x128xf32>
    %c0_29 = arith.constant 0 : index
    %c0_30 = arith.constant 0 : index
    %40 = vector.load %arg8[%c0_29, %c0_30] : memref<8x128xf32, #tpu.memory_space<vmem>>, vector<8x128xf32>
    tpu.vector_store %arg8[%c0_29, %c0_30], %39 {strides = array<i32>} : memref<8x128xf32, #tpu.memory_space<vmem>>, vector<8x128xf32>,
    %41 = vector.extract_strided_slice %38 {offsets = [0, 128], sizes = [8, 128], strides = [1, 1]} : vector<8x256xf32> to vector<8x128xf32>
    %cst_31 = arith.constant 0.000000e+00 : f32
    %42 = vector.broadcast %cst_31 : f32 to vector<8x128xf32>
    %43 = arith.maximumf %41, %42 : vector<8x128xf32>
    %44 = math.absf %41 : vector<8x128xf32>
    %cst_32 = arith.constant 0.000000e+00 : f32
    %45 = vector.broadcast %cst_32 : f32 to vector<8x128xf32>
    %46 = arith.subf %45, %44 : vector<8x128xf32>
    %47 = math.exp %46 : vector<8x128xf32>
    %48 = math.log1p %47 : vector<8x128xf32>
    %49 = arith.addf %43, %48 : vector<8x128xf32>
    %c0_33 = arith.constant 0 : index
    %c0_34 = arith.constant 0 : index
    %50 = vector.load %arg9[%c0_33, %c0_34] : memref<8x128xf32, #tpu.memory_space<vmem>>, vector<8x128xf32>
    tpu.vector_store %arg9[%c0_33, %c0_34], %49 {strides = array<i32>} : memref<8x128xf32, #tpu.memory_space<vmem>>, vector<8x128xf32>,
    return
  }
  func.func @transform_0(%arg0: i32) -> (i32, i32) {
    %c0_i32 = arith.constant 0 : i32
    %c0_i32_0 = arith.constant 0 : i32
    return %arg0, %c0_i32 : i32, i32
  }
  func.func @transform_1(%arg0: i32) -> (i32, i32) {
    %c0_i32 = arith.constant 0 : i32
    %c0_i32_0 = arith.constant 0 : i32
    %c0_i32_1 = arith.constant 0 : i32
    return %c0_i32, %c0_i32_0 : i32, i32
  }
  func.func @transform_2(%arg0: i32) -> (i32, i32) {
    %c0_i32 = arith.constant 0 : i32
    %c0_i32_0 = arith.constant 0 : i32
    %c0_i32_1 = arith.constant 0 : i32
    return %c0_i32, %c0_i32_0 : i32, i32
  }
  func.func @transform_3(%arg0: i32) -> (i32, i32) {
    %c0_i32 = arith.constant 0 : i32
    %c0_i32_0 = arith.constant 0 : i32
    %c0_i32_1 = arith.constant 0 : i32
    return %c0_i32, %c0_i32_0 : i32, i32
  }
  func.func @transform_4(%arg0: i32) -> (i32, i32) {
    %c0_i32 = arith.constant 0 : i32
    %c0_i32_0 = arith.constant 0 : i32
    %c0_i32_1 = arith.constant 0 : i32
    return %c0_i32, %c0_i32_0 : i32, i32
  }
  func.func @transform_5(%arg0: i32) -> (i32, i32) {
    %c0_i32 = arith.constant 0 : i32
    %c0_i32_0 = arith.constant 0 : i32
    %c0_i32_1 = arith.constant 0 : i32
    return %c0_i32, %c0_i32_0 : i32, i32
  }
  func.func @transform_6(%arg0: i32) -> (i32, i32) {
    %c0_i32 = arith.constant 0 : i32
    %c0_i32_0 = arith.constant 0 : i32
    %c0_i32_1 = arith.constant 0 : i32
    return %c0_i32, %c0_i32_0 : i32, i32
  }
  func.func @transform_7(%arg0: i32) -> (i32, i32) {
    %c0_i32 = arith.constant 0 : i32
    %c0_i32_0 = arith.constant 0 : i32
    return %arg0, %c0_i32 : i32, i32
  }
  func.func @transform_8(%arg0: i32) -> (i32, i32) {
    %c0_i32 = arith.constant 0 : i32
    %c0_i32_0 = arith.constant 0 : i32
    return %arg0, %c0_i32 : i32, i32
  }
}

</mosaic_0001>

<bundles_post_ra>
// kernel: tpu_custom_call.1
= control target key start
LH: loop header
LB: loop body
LE: loop exit
PB: predicated region body
PF: predicated region fallthrough
CT: control target
= control target key end

     0   :  { %14 = vsyncpa [#allocation4], 0  ;;  %s1779_s0 = inlined_call_operand.hbm [shape: f32[12,128], index: 0, kind: input, shape index: {}]   ;;  %s1780_s1 = inlined_call_operand.hbm [shape: bf16[128,128], index: 1, kind: input, shape index: {}]   ;;  %s1781_s2 = inlined_call_operand.vmem [shape: f32[1,128], index: 2, kind: input, shape index: {}]   ;;  %s1782_s3 = inlined_call_operand.hbm [shape: bf16[128,128], index: 3, kind: input, shape index: {}]   ;;  %s1783_s4 = inlined_call_operand.vmem [shape: f32[1,128], index: 4, kind: input, shape index: {}]   ;;  %s1784_s5 = inlined_call_operand.hbm [shape: bf16[128,256], index: 5, kind: input, shape index: {}]   ;;  %s1785_s6 = inlined_call_operand.vmem [shape: f32[1,256], index: 6, kind: input, shape index: {}]   ;;  %s1786_s7 = inlined_call_operand.hbm [shape: f32[12,128], index: 7, kind: output, shape index: {0}]   ;;  %s1787_s8 = inlined_call_operand.hbm [shape: f32[12,128], index: 8, kind: output, shape index: {1}]  }
   0x1   :  { %16 = vsyncpa [#allocation4 + $0x1], 0 }
   0x2   :  { %17 = vsyncpa [#allocation7], 0 }
   0x3   :  { %18 = vsyncpa [#allocation10], 0 }
   0x4   :  { %19 = vsyncpa [#allocation5], 0 }
   0x5   :  { %21 = vsyncpa [#allocation5 + $0x1], 0 }
   0x6   :  { %22 = vsyncpa [#allocation13], 0 }
   0x7   :  { %24 = vsyncpa [#allocation13 + $0x1], 0  ;;  %s1476_s27 = smov 0   ;;  %s1478_s28 = smov 0  }
   0x8   :  { %s1480_s29 = smov 0   ;;  %s1482_s30 = smov 0  }
   0x9 LB: > { %1793 = sst [smem:[#allocation19_spill]] %s1404_s27  ;;  %s1497_s9 = sadd.s32 4294967295, %s1416_s30   ;;  %s1416_s30 = sphi %s1482_s30, %s1817_s30   ;;  %s1412_s29 = sphi %s1480_s29, %s1816_s29   ;;  %s1408_s28 = sphi %s1478_s28, %s1815_s28   ;;  %s1404_s27 = sphi %s1476_s27, %s1814_s27  }
   0xa   : > { %s946_s10 = sadd.s32 4294967294, %s1416_s30   ;;  %p50_p0 = scmp.ne.s32.totalorder %s1408_s28, %s1404_s27 }
   0xb   : > { %p1788_p1 = scmp.eq.s32.totalorder %s1497_s9, 0  ;;  %p206_p3 = scmp.eq.s32.totalorder %s946_s10, 1 }
   0xc   : > { %p947_p5 = scmp.ge.s32.totalorder %s1416_s30, 1  ;;  %p239_p7 = scmp.lt.s32.totalorder %s1416_s30, 3 }
   0xd   : > { %p1506_p4 = por %p1788_p1, %p50_p0  ;;  %p1511_p6 = por %p206_p3, %p50_p0 }
   0xe   : > { %p1516_p8 = pnand %p947_p5, %p239_p7  ;;  %s1418_s14 = smov [#allocation6]  }
   0xf   : > { %s1794_s11 = scalar_select %p1506_p4, 1, 0 }
  0x10   : > { %s1795_s12 = scalar_select %p1511_p6, 1, 0 }
  0x11   : > { %s1797_s13 = scalar_select %p1516_p8, 1, 0 }
  0x12   : > { %1796 = sst [smem:[#allocation20_spill]] %s1795_s12  ;;  %s251_s15 = sshll.u32 %s1418_s14, 4  ;;  %s1520_s15 = int_to_ptr.vmem [resolvable:$true] %s251_s15 }
  0x13   : > { %p1077_p9 = pneg %p1516_p8  ;;  %s1419_s17 = smov [#allocation8]  }
  0x14   : > { %s267_s18 = sshll.u32 %s1419_s17, 4  ;;  %s1420_s19 = smov [#allocation9]   ;;  %s1531_s18 = int_to_ptr.vmem [resolvable:$true] %s267_s18 }
  0x15   : > { %p1527_p11 = pnand %p1077_p9, %p1788_p1  ;;  %s1533_s20 = sshll.u32 %s1420_s19, 4  ;;  %s284_s20 = int_to_ptr.vmem [resolvable:$true] %s1533_s20 }
  0x16   : > { %s1196_s23 = scalar_lea.hbm %s1780_s1, 1024 }
  0x17   : > { %p1197_p12 = scmp.ne.s32.totalorder %s1780_s1, %s1196_s23  ;;  %p1543_p13 = pneg %p1527_p11 }
  0x18   : > { %p1203_p5 = scmp.lt.u32.totalorder %s1196_s23, %s1780_s1 }
  0x19   : > { %p1199_p0 = pnand %p1543_p13, %p1197_p12 }
  0x1b   : > { %p1200_p3 = pneg %p1199_p0 }
  0x1d   : > { %p1205_p7 = pnand %p1203_p5, %p1200_p3 }
  0x1f   : > { %1208 = shalt.err (!%p1205_p7)
}
  0x20   : > { %s1209_s17 = scalar_lea.vmem %s1520_s15, 1024  ;;  %p1217_p2 = scmp.lt.s32.totalorder %s1520_s15, %s1520_s15 }
  0x21   : > { %p1210_p9 = scmp.ne.s32.totalorder %s1520_s15, %s1209_s17  ;;  %p1218_p6 = scmp.lt.s32.totalorder %s1209_s17, %s1209_s17 }
  0x23   : > { %p1212_p10 = pnand %p1210_p9, %p1543_p13  ;;  %p1219_p12 = por %p1218_p6, %p1217_p2 }
  0x25   : > { %p1213_p1 = pneg %p1212_p10 }
  0x27   : > { %p1220_p0 = pnand %p1219_p12, %p1213_p1 }
  0x29   : > { %1223 = shalt.err (!%p1220_p0)
}
  0x2a   : > { %s1421_s19 = smov 64   ;;  %s1422_s21 = smov 4  }
  0x2b   : > { %1080 = dma.hbm_to_vmem [thread:$0]  (!%p1527_p11), %s1780_s1, 1024, %s1520_s15, [#allocation7], %s1421_s19, %s1421_s19, %s1422_s21  }
  0x2c   : > { %s1224_s10 = scalar_lea.hbm %s1782_s3, 1024 }
  0x2d   : > { %p1225_p2 = scmp.ne.s32.totalorder %s1782_s3, %s1224_s10  ;;  %p1231_p10 = scmp.lt.u32.totalorder %s1224_s10, %s1782_s3 }
  0x2f   : > { %p1227_p1 = pnand %p1225_p2, %p1543_p13 }
  0x31   : > { %p1228_p6 = pneg %p1227_p1 }
  0x33   : > { %p1233_p3 = pnand %p1231_p10, %p1228_p6 }
  0x35   : > { %1236 = shalt.err (!%p1233_p3)
}
  0x36   : > { %s1237_s15 = scalar_lea.vmem %s1531_s18, 1024  ;;  %p1245_p12 = scmp.lt.s32.totalorder %s1531_s18, %s1531_s18 }
  0x37   : > { %p1238_p5 = scmp.ne.s32.totalorder %s1531_s18, %s1237_s15  ;;  %p1246_p0 = scmp.lt.s32.totalorder %s1237_s15, %s1237_s15 }
  0x39   : > { %p1240_p7 = pnand %p1238_p5, %p1543_p13  ;;  %p1247_p2 = por %p1246_p0, %p1245_p12 }
  0x3b   : > { %p1241_p9 = pneg %p1240_p7 }
  0x3d   : > { %p1248_p1 = pnand %p1247_p2, %p1241_p9 }
  0x3f   : > { %1251 = shalt.err (!%p1248_p1)
}
  0x40   : > { %1083 = dma.hbm_to_vmem [thread:$0]  (!%p1527_p11), %s1782_s3, 1024, %s1531_s18, [#allocation7], %s1421_s19, %s1421_s19, %s1422_s21  }
  0x41   : > { %s1252_s24 = scalar_lea.hbm %s1784_s5, 2048 }
  0x42   : > { %p1253_p6 = scmp.ne.s32.totalorder %s1784_s5, %s1252_s24  ;;  %p1259_p5 = scmp.lt.u32.totalorder %s1252_s24, %s1784_s5 }
  0x44   : > { %p1255_p10 = pnand %p1253_p6, %p1543_p13 }
  0x46   : > { %p1256_p3 = pneg %p1255_p10 }
  0x48   : > { %p1261_p7 = pnand %p1259_p5, %p1256_p3 }
  0x4a   : > { %1264 = shalt.err (!%p1261_p7)
}
  0x4b   : > { %s1265_s15 = scalar_lea.vmem %s284_s20, 2048  ;;  %p1273_p2 = scmp.lt.s32.totalorder %s284_s20, %s284_s20 }
  0x4c   : > { %p1266_p9 = scmp.ne.s32.totalorder %s284_s20, %s1265_s15  ;;  %p1274_p1 = scmp.lt.s32.totalorder %s1265_s15, %s1265_s15 }
  0x4e   : > { %p1268_p12 = pnand %p1266_p9, %p1543_p13  ;;  %p1275_p4 = por %p1274_p1, %p1273_p2 }
  0x50   : > { %p1269_p0 = pneg %p1268_p12 }
  0x52   : > { %p1276_p8 = pnand %p1275_p4, %p1269_p0 }
  0x54   : > { %1279 = shalt.err (!%p1276_p8)
}
  0x55   : > { %s1423_s18 = smov 128   ;;  %s1424_s26 = smov 8  }
  0x56   : > { %1086 = dma.hbm_to_vmem [thread:$0]  (!%p1527_p11), %s1784_s5, 2048, %s284_s20, [#allocation10], %s1423_s18, %s1423_s18, %s1424_s26  }
  0x57   : > { %s1607_s27 = sadd.s32 1, %s1416_s30   ;;  %s37_s22 = sadd.s32 1, %s1412_s29 }
  0x58   : > { %s34_s12 = ssub.s32 %s1416_s30, %s1607_s27  ;;  %p44_p8 = scmp.ne.s32.totalorder %s1412_s29, %s1408_s28 }
  0x59   : > { %p35_p4 = scmp.eq.s32.totalorder %s34_s12, 0  ;;  %p45_p13 = scmp.eq.s32.totalorder %s1416_s30, 0 }
  0x5a   : > { %p1101_p6 = scmp.lt.s32.totalorder %s1416_s30, 2  ;;  %p1800_p3 = scmp.eq.s32.totalorder %s1497_s9, 1 }
  0x5b   : > { %s1617_s23 = scalar_select %p35_p4, %s1412_s29, %s37_s22  }
  0x5c   : > { %p46_p10 = por %p45_p13, %p44_p8  ;;  %p1621_p5 = por %p1800_p3, %p44_p8 }
  0x5d   : > { %s300_s16 = sand.u32 1, %s1412_s29   ;;  %s953_s25 = sshll.u32 %s1416_s30, 7 }
  0x5e   : > { %s952_s20 = sshll.u32 %s300_s16, 3  ;;  %s1630_s17 = scalar_lea.hbm %s1779_s0, %s953_s25 }
  0x5f   : > { %s304_s15 = scalar_lea.vmem [#allocation3], %s952_s20  ;;  %p1632_p11 = pnand %p1101_p6, %p46_p10 }
  0x60   : > { %s311_s18 = sshll.u32 %s304_s15, 4  ;;  %s301_s19 = scalar_lea.sflag [#allocation4], %s300_s16  ;;  %s1636_s18 = int_to_ptr.vmem [resolvable:$true] %s311_s18 }
  0x61   : > { %s1280_s21 = scalar_lea.hbm %s1630_s17, 128  ;;  %p1282_p9 = pneg %p1632_p11 }
  0x62   : > { %p1281_p7 = scmp.ne.s32.totalorder %s1630_s17, %s1280_s21  ;;  %s1285_s25 = scalar_lea.hbm %s1779_s0, 256 }
  0x63   : > { %p1286_p2 = scmp.lt.u32.totalorder %s1630_s17, %s1779_s0  ;;  %p1287_p1 = scmp.lt.u32.totalorder %s1285_s25, %s1280_s21 }
  0x64   : > { %p1283_p12 = pnand %p1282_p9, %p1281_p7  ;;  %p1289_p8 = scmp.lt.u32.totalorder %s1280_s21, %s1630_s17 }
  0x65   : > { %p1288_p4 = por %p1287_p1, %p1286_p2 }
  0x66   : > { %p1284_p0 = pneg %p1283_p12 }
  0x67   : > { %p1290_p13 = por %p1289_p8, %p1288_p4 }
  0x69   : > { %p1291_p6 = pnand %p1290_p13, %p1284_p0 }
  0x6b   : > { %1294 = shalt.err (!%p1291_p6)
}
  0x6c   : > { %s1295_s16 = scalar_lea.vmem %s1636_s18, 128  ;;  %s1425_s14 = smov [#allocation3]  }
  0x6d   : > { %p1296_p10 = scmp.ne.s32.totalorder %s1636_s18, %s1295_s16  ;;  %s1300_s15 = sshll.u32 %s1425_s14, 4  ;;  %s1301_s15 = int_to_ptr.vmem [resolvable:$false] %s1300_s15 }
  0x6e   : > { %s1302_s12 = scalar_lea.vmem %s1301_s15, 256  ;;  %p1303_p12 = scmp.lt.s32.totalorder %s1636_s18, %s1301_s15 }
  0x6f   : > { %p1298_p3 = pnand %p1296_p10, %p1282_p9  ;;  %p1304_p2 = scmp.lt.s32.totalorder %s1302_s12, %s1295_s16 }
  0x71   : > { %p1299_p7 = pneg %p1298_p3  ;;  %p1305_p1 = por %p1304_p2, %p1303_p12 }
  0x73   : > { %p1306_p4 = pnand %p1305_p1, %p1299_p7 }
  0x75   : > { %1309 = shalt.err (!%p1306_p4)
}
  0x76   : > { %1090 = dma.hbm_to_vmem [thread:$0]  (!%p1632_p11), %s1630_s17, 128, %s1636_s18, %s301_s19  }
  0x77   : > { %p1803_p0 = scmp.ne.s32.totalorder %s1797_s13, 0 }
  0x78   : > { %s1666_s21 = sand.u32 (!%p1803_p0), 1, %s1408_s28   ;;  %p1804_p9 = scmp.ne.s32.totalorder (!%p1803_p0), %s1794_s11, 0 }
  0x79   : > { %320 = sbr.rel (%p1803_p0) target bundleno = 927 (0x39f), region = 48  ;;  %s1669_s22 = sshll.u32 (!%p1803_p0), %s1666_s21, 3 }
  0x7a   : > { %s323_s25 = scalar_lea.sflag (!%p1803_p0), [#allocation4], %s1666_s21  ;;  %s326_s20 = scalar_lea.vmem (!%p1803_p0), [#allocation3], %s1669_s22 }
  0x80   : > { %1383 = dma.done.wait (%p1804_p9), %s323_s25, 128  }
  0x81   : > { %1385 = vsyncadd (%p1804_p9), %s323_s25, 4294967168  ;;  %p1805_p11 = scmp.eq.s32.totalorder %s1497_s9, 0 }
  0x83   : > { %1387 = dma.done.wait (%p1805_p11), [#allocation7], 2048   ;;  %p1806_p8 = pmov %p1805_p11 }
  0x85   : > { %1389 = vsyncadd (%p1806_p8), [#allocation7], 4294965248  ;;  %p1807_p13 = pmov %p1806_p8 }
  0x86   : > { %p1808_p6 = pmov %p1806_p8 }
  0x87   : > { %1391 = dma.done.wait (%p1807_p13), [#allocation10], 2048  }
  0x88   : > { %1393 = vsyncadd (%p1808_p6), [#allocation10], 4294965248  ;;  %v1426_v0 = vmov 0.0   ;;  %vm1427_vm0 = vmmov 0   ;;  %v1148_v1 = vld [vmem:[#allocation6] sm:$0xff]   ;;  %v1149_v2 = vld [vmem:[#allocation6 + $0x8] sm:$0xff]   ;;  %v635_v62 = vlaneseq }
  0x89   : > { %1019 = vmatprep.subr.bf16.mxu0 %v1426_v0  ;;  %1035 = vmatprep.mubr.msk.bf16.mxu0 %vm1427_vm0, %v1426_v0  ;;  %v1150_v3 = vld [vmem:[#allocation6 + $0x10] sm:$0xff]   ;;  %v1151_v4 = vld [vmem:[#allocation6 + $0x18] sm:$0xff]   ;;  %v1156_v5 = vld [vmem:[#allocation8] sm:$0xff]   ;;  %v1428_v48 = vmov 0   ;;  %s997_s10 = sshll.u32 %s1497_s9, 7  ;;  %s368_s16 = scalar_lea.vmem [#allocation11], %s1669_s22 }
  0x8a   : > { %1039 = vmatprep.subr.bf16.mxu1 %v1426_v0  ;;  %1055 = vmatprep.mubr.msk.bf16.mxu1 %vm1427_vm0, %v1426_v0  ;;  %v1152_v6 = vld [vmem:[#allocation6 + $0x20] sm:$0xff]   ;;  %v1153_v7 = vld [vmem:[#allocation6 + $0x28] sm:$0xff]   ;;  %v1154_v8 = vld [vmem:[#allocation6 + $0x30] sm:$0xff]   ;;  %v636_v63 = vshrl.u32 %v635_v62, 7  ;;  %s802_s14 = sshll.u32 %s368_s16, 4  ;;  %s1703_s25 = scalar_lea.hbm %s1786_s7, %s997_s10  ;;  %s1705_s14 = int_to_ptr.vmem [resolvable:$true] %s802_s14 }
  0x8b   : > { %1020 = vmatpush3.bf16.msra.mxu0 %v1148_v1  ;;  %1040 = vmatpush3.bf16.msra.mxu1 %v1156_v5  ;;  %v1155_v9 = vld [vmem:[#allocation6 + $0x38] sm:$0xff]   ;;  %v1157_v12 = vld [vmem:[#allocation8 + $0x8] sm:$0xff]   ;;  %v1158_v13 = vld [vmem:[#allocation8 + $0x10] sm:$0xff]   ;;  %s1310_s11 = scalar_lea.vmem %s1705_s14, 128  ;;  %s1429_s13 = smov [#allocation11]  }
  0x8c   : > { %1021 = vmatprep.subr.bf16.mxu0 %v1426_v0  ;;  %1041 = vmatprep.subr.bf16.mxu1 %v1426_v0  ;;  %v377_v10 = vld [vmem:[%s326_s20] sm:$0xff]  ;;  %v1160_v15 = vld [vmem:[#allocation8 + $0x20] sm:$0xff]   ;;  %v1161_v16 = vld [vmem:[#allocation8 + $0x28] sm:$0xff]   ;;  %s784_s20 = scalar_lea.sflag [#allocation5], %s1666_s21  ;;  %p1311_p10 = scmp.ne.s32.totalorder %s1705_s14, %s1310_s11 }
  0x8d   : > { %v378_v11 = vpack.c.bf16 %v377_v10, %v377_v10  ;;  %v1159_v14 = vld [vmem:[#allocation8 + $0x18] sm:$0xff]   ;;  %v1162_v17 = vld [vmem:[#allocation8 + $0x30] sm:$0xff]   ;;  %v1164_v19 = vld [vmem:[#allocation9] ss:$8 sps:$4 sm:$0xff]   ;;  %s1314_s17 = sshll.u32 %s1429_s13, 4  ;;  %s1315_s17 = int_to_ptr.vmem [resolvable:$false] %s1314_s17 }
  0x8e   : > { %v1163_v18 = vld [vmem:[#allocation8 + $0x38] sm:$0xff]   ;;  %v1166_v20 = vld [vmem:[#allocation9 + $0x4] ss:$8 sps:$4 sm:$0xff]   ;;  %v1170_v37 = vld [vmem:[#allocation9 + $0x20] ss:$8 sps:$4 sm:$0xff]   ;;  %p1312_p3 = pnand %p1311_p10, %p1621_p5  ;;  %s1316_s18 = scalar_lea.vmem %s1315_s17, 256 }
  0x8f   : > { %1022 = vmatpush3.bf16.msra.mxu0 %v1149_v2  ;;  %1042 = vmatpush3.bf16.msra.mxu1 %v1157_v12  ;;  %v961_v21 = vld [vmem:[%s1781_s2] ss:$0 sm:$0xff]  ;;  %v1169_v34 = vld [vmem:[#allocation9 + $0x14] ss:$8 sps:$4 sm:$0xff]   ;;  %v1167_v35 = vld [vmem:[#allocation9 + $0x10] ss:$8 sps:$4 sm:$0xff]   ;;  %p1317_p12 = scmp.lt.s32.totalorder %s1705_s14, %s1315_s17  ;;  %p1318_p2 = scmp.lt.s32.totalorder %s1316_s18, %s1310_s11 }
  0x90   : > { %1023 = vmatprep.subr.bf16.mxu0 %v1426_v0  ;;  %1043 = vmatprep.subr.bf16.mxu1 %v1426_v0  ;;  %v1172_v36 = vld [vmem:[#allocation9 + $0x24] ss:$8 sps:$4 sm:$0xff]   ;;  %v1175_v38 = vld [vmem:[#allocation9 + $0x34] ss:$8 sps:$4 sm:$0xff]   ;;  %v1173_v39 = vld [vmem:[#allocation9 + $0x30] ss:$8 sps:$4 sm:$0xff]   ;;  %p1313_p7 = pneg %p1312_p3 }
  0x91   : > { %v1178_v40 = vld [vmem:[#allocation9 + $0x44] ss:$8 sps:$4 sm:$0xff]   ;;  %v1176_v41 = vld [vmem:[#allocation9 + $0x40] ss:$8 sps:$4 sm:$0xff]   ;;  %v1181_v42 = vld [vmem:[#allocation9 + $0x54] ss:$8 sps:$4 sm:$0xff]   ;;  %p1319_p1 = por %p1318_p2, %p1317_p12 }
  0x92   : > { %v1179_v43 = vld [vmem:[#allocation9 + $0x50] ss:$8 sps:$4 sm:$0xff]   ;;  %v1184_v44 = vld [vmem:[#allocation9 + $0x64] ss:$8 sps:$4 sm:$0xff]   ;;  %v1182_v45 = vld [vmem:[#allocation9 + $0x60] ss:$8 sps:$4 sm:$0xff]  }
  0x93   : > { %1024 = vmatpush3.bf16.msra.mxu0 %v1150_v3  ;;  %1044 = vmatpush3.bf16.msra.mxu1 %v1158_v13  ;;  %v1187_v46 = vld [vmem:[#allocation9 + $0x74] ss:$8 sps:$4 sm:$0xff]   ;;  %v1185_v47 = vld [vmem:[#allocation9 + $0x70] ss:$8 sps:$4 sm:$0xff]   ;;  %v970_v49 = vld [vmem:[%s1783_s4] ss:$0 sm:$0xff]  ;;  %p1320_p4 = pnand %p1319_p1, %p1313_p7 }
  0x94   : > { %1025 = vmatprep.subr.bf16.mxu0 %v1426_v0  ;;  %1045 = vmatprep.subr.bf16.mxu1 %v1426_v0  ;;  %v633_v1 = vld [vmem:[%s1785_s6] sm:$0x3]  ;;  %v641_v2 = vsub.s32 1, %v636_v63 }
  0x97   : > { %1026 = vmatpush3.bf16.msra.mxu0 %v1151_v4  ;;  %1046 = vmatpush3.bf16.msra.mxu1 %v1159_v14  ;;  %v642_v4 = vrot.slane %v633_v1, %v641_v2 }
  0x98   : > { %1027 = vmatprep.subr.bf16.mxu0 %v1426_v0  ;;  %1047 = vmatprep.subr.bf16.mxu1 %v1426_v0 }
  0x9b   : > { %1028 = vmatpush3.bf16.msra.mxu0 %v1152_v6  ;;  %1048 = vmatpush3.bf16.msra.mxu1 %v1160_v15 }
  0x9c   : > { %1029 = vmatprep.subr.bf16.mxu0 %v1426_v0  ;;  %1049 = vmatprep.subr.bf16.mxu1 %v1426_v0 }
  0x9f   : > { %1030 = vmatpush3.bf16.msra.mxu0 %v1153_v7  ;;  %1050 = vmatpush3.bf16.msra.mxu1 %v1161_v16 }
  0xa0   : > { %1031 = vmatprep.subr.bf16.mxu0 %v1426_v0  ;;  %1051 = vmatprep.subr.bf16.mxu1 %v1426_v0 }
  0xa3   : > { %1032 = vmatpush3.bf16.msra.mxu0 %v1154_v8  ;;  %1052 = vmatpush3.bf16.msra.mxu1 %v1162_v17 }
  0xa4   : > { %1033 = vmatprep.subr.bf16.mxu0 %v1426_v0  ;;  %1053 = vmatprep.subr.bf16.mxu1 %v1426_v0  ;;  %v637_v0 = vsub.s32 0, %v636_v63 }
  0xa6   : > { %v638_v3 = vrot.slane %v633_v1, %v637_v0 }
  0xa7   : > { %1034 = vmatpush3.bf16.msra.mxu0 %v1155_v9  ;;  %1054 = vmatpush3.bf16.msra.mxu1 %v1163_v18 }
  0xa8   : > { %725 = vmatprep.subr.bf16.mxu0 %v1166_v20 }
  0xaa   : > { %1036 = vmatmul.mubr.bf16.vlgmr.msra.gmra.mrb[0].mxu0 %v378_v11 }
  0xab   : > { %726 = vmatpush1.bf16.msra.mxu0 %v1164_v19  ;;  %757 = vmatprep.mubr.bf16.mxu0 %v1428_v48 }
  0xac   : > { %727 = vmatprep.subr.bf16.mxu0 %v1169_v34 }
  0xaf   : > { %728 = vmatpush1.bf16.msra.mxu0 %v1167_v35 }
  0xb0   : > { %729 = vmatprep.subr.bf16.mxu0 %v1172_v36 }
  0xb3   : > { %730 = vmatpush1.bf16.msra.mxu0 %v1170_v37 }
  0xb4   : > { %731 = vmatprep.subr.bf16.mxu0 %v1175_v38 }
  0xb7   : > { %732 = vmatpush1.bf16.msra.mxu0 %v1173_v39 }
  0xb8   : > { %733 = vmatprep.subr.bf16.mxu0 %v1178_v40 }
  0xbb   : > { %734 = vmatpush1.bf16.msra.mxu0 %v1176_v41 }
  0xbc   : > { %735 = vmatprep.subr.bf16.mxu0 %v1181_v42 }
  0xbf   : > { %736 = vmatpush1.bf16.msra.mxu0 %v1179_v43 }
  0xc0   : > { %737 = vmatprep.subr.bf16.mxu0 %v1184_v44 }
  0xc3   : > { %738 = vmatpush1.bf16.msra.mxu0 %v1182_v45 }
  0xc4   : > { %739 = vmatprep.subr.bf16.mxu0 %v1187_v46 }
  0xc7   : > { %740 = vmatpush1.bf16.msra.mxu0 %v1185_v47 }
 0x17d   : > { %v484_v22 = vpop.f32.mrb[0].mxu0 }
 0x17e   : > { %v485_v23 = vadd.f32 %v961_v21, %v484_v22  ;;  %v1037_v24 = vpop.f32.mrb[1].mxu0 }
 0x17f   : > { %v487_v25 = vpop.f32.mrb[2].mxu0 }
 0x180   : > { %v491_v26 = vmul.f32 0.70710677, %v485_v23  ;;  %v1038_v27 = vpop.f32.mrb[3].mxu0  ;;  %v490_v29 = vmul.f32 0.5, %v485_v23 }
 0x182   : > { %1188 = verf.f32 %v491_v26 }
 0x18c   : > { %v1189_v28 = vpop.eup %1188 }
 0x18d   : > { %v493_v30 = vadd.f32 1.0, %v1189_v28 }
 0x18f   : > { %v494_v31 = vmul.f32 %v493_v30, %v490_v29 }
 0x191   : > { %v495_v32 = vpack.c.bf16 %v494_v31, %v494_v31 }
 0x193   : > { %496 = vst [vmem:[#allocation2] sm:$0xf] %v495_v32 }
 0x19a   : > { %v497_v33 = vld [vmem:[#allocation2] sm:$0xf] }
 0x19b   : > { %1056 = vmatmul.mubr.bf16.vlgmr.msra.gmra.mrb[0].mxu1 %v497_v33 }
 0x26e   : > { %v603_v50 = vpop.f32.mrb[0].mxu1 }
 0x26f   : > { %v604_v51 = vadd.f32 %v970_v49, %v603_v50  ;;  %v1057_v52 = vpop.f32.mrb[1].mxu1 }
 0x270   : > { %v606_v53 = vpop.f32.mrb[2].mxu1 }
 0x271   : > { %v610_v54 = vmul.f32 0.70710677, %v604_v51  ;;  %v1058_v55 = vpop.f32.mrb[3].mxu1  ;;  %v609_v57 = vmul.f32 0.5, %v604_v51 }
 0x273   : > { %1190 = verf.f32 %v610_v54 }
 0x27d   : > { %v1191_v56 = vpop.eup %1190 }
 0x27e   : > { %v612_v58 = vadd.f32 1.0, %v1191_v56 }
 0x280   : > { %v613_v59 = vmul.f32 %v612_v58, %v609_v57 }
 0x282   : > { %v614_v60 = vpack.c.bf16 %v613_v59, %v613_v59 }
 0x284   : > { %615 = vst [vmem:[#allocation2] sm:$0xf] %v614_v60 }
 0x28b   : > { %v616_v61 = vld [vmem:[#allocation2] sm:$0xf] }
 0x28c   : > { %758 = vmatmul.mubr.bf16.vlgmr.msra.gmra.mrb[4].mxu0 %v616_v61 }
 0x35f   : > { %v759_v5 = vpop.f32.mrb[4].mxu0 }
 0x360   : > { %v760_v6 = vadd.f32 %v759_v5, %v638_v3  ;;  %v761_v7 = vpop.f32.mrb[5].mxu0 }
 0x361   : > { %v762_v8 = vadd.f32 %v761_v7, %v642_v4  ;;  %v763_v9 = vpop.f32.mrb[6].mxu0 }
 0x362   : > { %766 = vst [vmem:[%s368_s16] sm:$0xff] %v760_v6  ;;  %v764_v10 = vpop.f32.mrb[7].mxu0 }
 0x363   : > { %v768_v11 = vand.u32 2147483647, %v762_v8 }
 0x364   : > { %1323 = shalt.err (!%p1320_p4)
}
 0x365   : > { %s1324_s26 = scalar_lea.hbm %s1703_s25, 128  ;;  %s1328_s15 = scalar_lea.hbm %s1786_s7, 256 }
 0x366   : > { %p1325_p0 = scmp.ne.s32.totalorder %s1703_s25, %s1324_s26  ;;  %p1329_p8 = scmp.lt.u32.totalorder %s1703_s25, %s1786_s7 }
 0x367   : > { %p1330_p13 = scmp.lt.u32.totalorder %s1328_s15, %s1324_s26  ;;  %p1332_p10 = scmp.lt.u32.totalorder %s1324_s26, %s1703_s25 }
 0x368   : > { %p1326_p9 = pnand %p1325_p0, %p1621_p5 }
 0x369   : > { %p1331_p6 = por %p1330_p13, %p1329_p8 }
 0x36a   : > { %p1327_p11 = pneg %p1326_p9 }
 0x36b   : > { %p1333_p3 = por %p1332_p10, %p1331_p6 }
 0x36d   : > { %p1334_p7 = pnand %p1333_p3, %p1327_p11 }
 0x36f   : > { %1337 = shalt.err (!%p1334_p7)
}
 0x370   : > { %1073 = dma.vmem_to_hbm [thread:$0]  (%p1621_p5), %s1705_s14, 128, %s1703_s25, %s784_s20   ;;  %v769_v12 = vsub.f32 0.0, %v768_v11  ;;  %v767_v22 = vmax.f32 %v762_v8, 0.0 }
 0x371   : > { %s375_s11 = scalar_lea.vmem [#allocation12], %s1669_s22  ;;  %s1735_s20 = scalar_lea.hbm %s1787_s8, %s997_s10 }
 0x372   : > { %v770_v13 = vmul.f32 1.442695, %v769_v12  ;;  %s815_s17 = sshll.u32 %s375_s11, 4  ;;  %s789_s18 = scalar_lea.sflag [#allocation13], %s1666_s21  ;;  %s1737_s17 = int_to_ptr.vmem [resolvable:$true] %s815_s17 }
 0x373   : > { %s1338_s26 = scalar_lea.vmem %s1737_s17, 128  ;;  %s1430_s22 = smov [#allocation12]  }
 0x374   : > { %1192 = vpow2.f32 %v770_v13  ;;  %p1339_p12 = scmp.ne.s32.totalorder %s1737_s17, %s1338_s26  ;;  %s1342_s19 = sshll.u32 %s1430_s22, 4  ;;  %s1343_s19 = int_to_ptr.vmem [resolvable:$false] %s1342_s19 }
 0x375   : > { %s1344_s9 = scalar_lea.vmem %s1343_s19, 256  ;;  %p1345_p4 = scmp.lt.s32.totalorder %s1737_s17, %s1343_s19 }
 0x376   : > { %p1340_p2 = pnand %p1339_p12, %p1621_p5  ;;  %p1346_p0 = scmp.lt.s32.totalorder %s1344_s9, %s1338_s26 }
 0x378   : > { %p1341_p1 = pneg %p1340_p2  ;;  %p1347_p9 = por %p1346_p0, %p1345_p4 }
 0x37a   : > { %p1348_p11 = pnand %p1347_p9, %p1341_p1 }
 0x37e   : > { %v1193_v14 = vpop.eup %1192 }
 0x37f   : > { %v772_v15 = vadd.f32 1.0, %v1193_v14  ;;  %v775_v16 = vmul.f32 -0.5, %v1193_v14  ;;  %v778_v18 = vand.u32 2147483647, %v1193_v14 }
 0x381   : > { %1194 = vlog2.f32 %v772_v15  ;;  %v776_v17 = vadd.f32 1.0, %v775_v16  ;;  %vm779_vm1 = vcmp.lt.f32.partialorder %v778_v18, 0.0004427343 }
 0x383   : > { %v777_v21 = vmul.f32 %v1193_v14, %v776_v17 }
 0x38b   : > { %v1195_v19 = vpop.eup %1194 }
 0x38c   : > { %v774_v20 = vmul.f32 0.6931472, %v1195_v19 }
 0x38e   : > { %v780_v23 = vsel %vm779_vm1, %v777_v21, %v774_v20 }
 0x38f   : > { %v781_v24 = vadd.f32 %v780_v23, %v767_v22 }
 0x391   : > { %782 = vst [vmem:[%s375_s11] sm:$0xff] %v781_v24 }
 0x392   : > { %1351 = shalt.err (!%p1348_p11)
}
 0x393   : > { %s1352_s21 = scalar_lea.hbm %s1735_s20, 128  ;;  %s1356_s15 = scalar_lea.hbm %s1787_s8, 256 }
 0x394   : > { %p1353_p8 = scmp.ne.s32.totalorder %s1735_s20, %s1352_s21  ;;  %p1357_p10 = scmp.lt.u32.totalorder %s1735_s20, %s1787_s8 }
 0x395   : > { %p1358_p3 = scmp.lt.u32.totalorder %s1356_s15, %s1352_s21  ;;  %p1360_p12 = scmp.lt.u32.totalorder %s1352_s21, %s1735_s20 }
 0x396   : > { %p1354_p13 = pnand %p1353_p8, %p1621_p5 }
 0x397   : > { %p1359_p7 = por %p1358_p3, %p1357_p10 }
 0x398   : > { %p1355_p6 = pneg %p1354_p13 }
 0x399   : > { %p1361_p2 = por %p1360_p12, %p1359_p7 }
 0x39b   : > { %p1362_p1 = pnand %p1361_p2, %p1355_p6 }
 0x39d   : > { %1365 = shalt.err (!%p1362_p1)
}
 0x39e   : > { %1074 = dma.vmem_to_hbm [thread:$0]  (%p1621_p5), %s1737_s17, 128, %s1735_s20, %s789_s18  }
 0x39f PF: > { %s1809_s11 = sld [smem:[#allocation19_spill]]  ;;  %s1810_s14 = sld [smem:[#allocation20_spill]] }
 0x3a0   : > { %p1812_p0 = scmp.ge.s32.totalorder %s1416_s30, 2 }
 0x3a5   : > { %s827_s25 = sand.u32 1, %s1809_s11   ;;  %p1811_p4 = scmp.ne.s32.totalorder %s1810_s14, 0 }
 0x3a6   : > { %s828_s26 = scalar_lea.sflag [#allocation5], %s827_s25 }
 0x3a7   : > { %p1092_p9 = pnand %p1812_p0, %p1811_p4 }
 0x3a9   : > { %1395 = dma.done.wait (!%p1092_p9), %s828_s26, 128  }
 0x3aa   : > { %1397 = vsyncadd (!%p1092_p9), %s828_s26, 4294967168  ;;  %s837_s22 = scalar_lea.sflag [#allocation13], %s827_s25 }
 0x3ab   : > { %1399 = dma.done.wait (!%p1092_p9), %s837_s22, 128  }
 0x3ac   : > { %1401 = vsyncadd (!%p1092_p9), %s837_s22, 4294967168  ;;  %s1813_s24 = smov %s1607_s27  ;;  %p27_p5 = scmp.ge.s32.totalorder %s1607_s27, 4  }
 0x3ad   : > { %s1814_s27 = smov %s1408_s28  ;;  %s1815_s28 = smov %s1412_s29 }
 0x3ae   : > { %s1816_s29 = smov %s1617_s23  ;;  %s1817_s30 = smov %s1813_s24 }
 0x3af   :  { %29 = sbr.rel (!%p27_p5) target bundleno = 9 (0x9), region = 122 }
 0x3b6   :  { %842 = vsyncpa [#allocation4], 1 }
 0x3b7   :  { %844 = vsyncpa [#allocation4 + $0x1], 1 }
 0x3b8   :  { %845 = vsyncpa [#allocation7], 1 }
 0x3b9   :  { %846 = vsyncpa [#allocation10], 1 }
 0x3ba   :  { %847 = vsyncpa [#allocation5], 1 }
 0x3bb   :  { %849 = vsyncpa [#allocation5 + $0x1], 1 }
 0x3bc   :  { %850 = vsyncpa [#allocation13], 1 }
 0x3bd   :  { %852 = vsyncpa [#allocation13 + $0x1], 1 }

</bundles_post_ra>
